<compile_context>
chip_gen: v6e
topology: v6e:2x2x1
jax: 0.10.0
libtpu: 0.0.40
codegen_flags: <defaults>
</compile_context>

<pallas_src>
import functools

import jax
import jax.numpy as jnp
from jax.experimental import pallas as pl
from jax.experimental.pallas import tpu as pltpu

# Whole-array VMEM block (used only for the tiny final head kernel).
VMEM_SPEC = pl.BlockSpec(memory_space=pltpu.MemorySpace.VMEM)

_STACK_ORDER = (
    "ln1_g", "ln1_b", "in_proj_w", "in_proj_b", "out_proj_w", "out_proj_b",
    "ln2_g", "ln2_b", "fc_w", "fc_b", "proj_w", "proj_b",
)


# ----------------------------------------------------------------------------
# In-kernel helpers
# ----------------------------------------------------------------------------

def _ln(x, g, b, eps):
    # Matches torch.nn.LayerNorm (biased variance), f32 math.
    mean = jnp.mean(x, axis=-1, keepdims=True)
    xc = x - mean
    var = jnp.mean(xc * xc, axis=-1, keepdims=True)
    return xc * jax.lax.rsqrt(var + eps) * g + b


# ----------------------------------------------------------------------------
# Fused ResidualAttentionBlock stack kernel.
# One grid point = (batch element b, layer l).  x_ref (output) is resident in
# VMEM across the layer axis and carries the activation between layers.
# ----------------------------------------------------------------------------

def _clip_layer_kernel(x0_ref, pos_ref, mask_ref,
                       ln1_g_ref, ln1_b_ref, wqkv_ref, bqkv_ref, wo_ref, bo_ref,
                       ln2_g_ref, ln2_b_ref, wfc_ref, bfc_ref, wpr_ref, bpr_ref,
                       x_ref, *, n_heads, eps):
    l = pl.program_id(1)

    # Layer 0: initialize the resident activation = prompts + positional embedding.
    @pl.when(l == 0)
    def _():
        x_ref[...] = x0_ref[...] + pos_ref[...]

    S, D = x_ref.shape
    dh = D // n_heads
    scale = dh ** -0.5

    x = x_ref[...].astype(jnp.float32)                       # [S, D]

    # ---- attention branch: x + out_proj(attn(ln_1(x))) ----
    h = _ln(x, ln1_g_ref[...], ln1_b_ref[...], eps)
    qkv = jnp.dot(h.astype(wqkv_ref.dtype), wqkv_ref[...],
                  preferred_element_type=jnp.float32) + bqkv_ref[...]   # [S, 3D]

    head_outs = []
    for hh in range(n_heads):                                # static unroll over heads
        q = qkv[:, hh * dh:(hh + 1) * dh].astype(jnp.bfloat16)          # [S, dh]
        k = qkv[:, D + hh * dh:D + (hh + 1) * dh].astype(jnp.bfloat16)
        v = qkv[:, 2 * D + hh * dh:2 * D + (hh + 1) * dh].astype(jnp.bfloat16)
        # scores = q @ k^T (f32 accumulation), causal mask, softmax
        s = jax.lax.dot_general(q, k, (((1,), (1,)), ((), ())),
                                preferred_element_type=jnp.float32) * scale
        s = s + mask_ref[...]
        m = jnp.max(s, axis=-1, keepdims=True)
        p = jnp.exp(s - m)
        p = p * pl.reciprocal(jnp.sum(p, axis=-1, keepdims=True), approx=True)
        head_outs.append(jnp.dot(p.astype(jnp.bfloat16), v,
                                 preferred_element_type=jnp.float32))   # [S, dh]
    o = jnp.concatenate(head_outs, axis=-1)                  # [S, D] lane-dense merge
    attn = jnp.dot(o.astype(wo_ref.dtype), wo_ref[...],
                   preferred_element_type=jnp.float32) + bo_ref[...]
    x = x + attn

    # ---- MLP branch: x + c_proj(QuickGELU(c_fc(ln_2(x)))) ----
    h = _ln(x, ln2_g_ref[...], ln2_b_ref[...], eps)
    h = jnp.dot(h.astype(wfc_ref.dtype), wfc_ref[...],
                preferred_element_type=jnp.float32) + bfc_ref[...]
    h = h * jax.nn.sigmoid(1.702 * h)                        # CLIP QuickGELU
    h = jnp.dot(h.astype(wpr_ref.dtype), wpr_ref[...],
                preferred_element_type=jnp.float32) + bpr_ref[...]
    x = x + h

    x_ref[...] = x.astype(x_ref.dtype)


def clip_transformer_stack(prompts, pos, mask, stacked, n_heads, eps=1e-5):
    """Fused (pos-add + L residual attention blocks) in a single pallas_call."""
    B, S, D = prompts.shape
    L = stacked["ln1_g"].shape[0]

    act_spec = pl.BlockSpec((None, S, D), lambda b, l: (b, 0, 0))

    def const_spec(arr):
        n = arr.ndim
        return pl.BlockSpec(arr.shape, lambda b, l: (0,) * n)

    def layer_spec(arr):
        n = arr.ndim
        return pl.BlockSpec((None,) + arr.shape[1:],
                            lambda b, l: (l,) + (0,) * (n - 1))

    in_specs = [act_spec, const_spec(pos), const_spec(mask)]
    in_specs += [layer_spec(stacked[name]) for name in _STACK_ORDER]

    grid_spec = pltpu.PrefetchScalarGridSpec(
        num_scalar_prefetch=0,
        grid=(B, L),
        in_specs=in_specs,
        out_specs=act_spec,
    )

    kernel = functools.partial(_clip_layer_kernel, n_heads=n_heads, eps=eps)
    return pl.pallas_call(
        kernel,
        out_shape=jax.ShapeDtypeStruct((B, S, D), prompts.dtype),
        grid_spec=grid_spec,
        compiler_params=pltpu.CompilerParams(
            dimension_semantics=("parallel", "arbitrary")),
    )(prompts, pos, mask, *[stacked[name] for name in _STACK_ORDER])


# ----------------------------------------------------------------------------
# Final head: ln_final + text_projection, fused, applied only to the B gathered
# EOT tokens (LayerNorm is per-token so it commutes with the gather).
# ----------------------------------------------------------------------------

def _head_kernel(x_ref, g_ref, b_ref, w_ref, o_ref, *, eps):
    h = _ln(x_ref[...].astype(jnp.float32), g_ref[...], b_ref[...], eps)
    o_ref[...] = jnp.dot(h.astype(w_ref.dtype), w_ref[...],
                         preferred_element_type=jnp.float32).astype(o_ref.dtype)


def ln_project(x, gamma, beta, w, eps=1e-5):
    B = x.shape[0]
    E = w.shape[1]
    return pl.pallas_call(
        functools.partial(_head_kernel, eps=eps),
        out_shape=jax.ShapeDtypeStruct((B, E), x.dtype),
        in_specs=[VMEM_SPEC, VMEM_SPEC, VMEM_SPEC, VMEM_SPEC],
        out_specs=VMEM_SPEC,
    )(x, gamma, beta, w)


# ----------------------------------------------------------------------------
# TextEncoder.forward
# ----------------------------------------------------------------------------

def text_encoder_forward(prompts, tokenized_prompts, params, n_heads):
    """Mirrors TextEncoder.forward from trainers/joapr.py."""
    B, S, D = prompts.shape

    # causal attention mask (CLIP build_attention_mask)
    mask = jnp.triu(jnp.full((S, S), -1e9, dtype=jnp.float32), k=1)

    # x = prompts + positional_embedding; x = transformer(x)
    # (permute to LND and back is layout-only; see header)
    x = clip_transformer_stack(prompts, params["positional_embedding"], mask,
                               params["stacked"], n_heads)

    # x = ln_final(x)[arange(B), argmax(tokenized)] @ text_projection
    # LayerNorm is per-token -> gather EOT rows first, then LN + projection.
    eot = jnp.argmax(tokenized_prompts, axis=-1)              # [B]
    eot_tok = x[jnp.arange(B), eot]                           # [B, D]
    return ln_project(eot_tok, params["lnf_g"], params["lnf_b"],
                      params["text_projection"])              # [B, E]


# ----------------------------------------------------------------------------
# Deterministic synthetic parameters (per-layer tensors stacked to [L, ...];
# matmul weights stored pre-transposed to [in, out] and cast to bf16).
# ----------------------------------------------------------------------------

def init_params(key, n_layers, seq_len, d_model, embed_dim):
    def nrm(k, shape, scale=0.02):
        return (scale * jax.random.normal(k, shape)).astype(jnp.float32)

    keys = jax.random.split(key, 2 + n_layers)
    blocks = []
    for i in range(n_layers):
        bk = jax.random.split(keys[2 + i], 4)
        blocks.append({
            "ln1_g": jnp.ones((1, d_model), jnp.float32),
            "ln1_b": jnp.zeros((1, d_model), jnp.float32),
            "in_proj_w": nrm(bk[0], (d_model, 3 * d_model)),
            "in_proj_b": jnp.zeros((1, 3 * d_model), jnp.float32),
            "out_proj_w": nrm(bk[1], (d_model, d_model)),
            "out_proj_b": jnp.zeros((1, d_model), jnp.float32),
            "ln2_g": jnp.ones((1, d_model), jnp.float32),
            "ln2_b": jnp.zeros((1, d_model), jnp.float32),
            "fc_w": nrm(bk[2], (d_model, 4 * d_model)),
            "fc_b": jnp.zeros((1, 4 * d_model), jnp.float32),
            "proj_w": nrm(bk[3], (4 * d_model, d_model)),
            "proj_b": jnp.zeros((1, d_model), jnp.float32),
        })

    stacked = {}
    for name in _STACK_ORDER:
        arr = jnp.stack([blk[name] for blk in blocks], axis=0)   # [L, ...]
        if name.endswith("_w"):
            arr = arr.astype(jnp.bfloat16)    # bf16 MXU inputs, f32 accumulation
        stacked[name] = arr

    return {
        "positional_embedding": nrm(keys[0], (seq_len, d_model)),
        "text_projection": nrm(keys[1], (d_model, embed_dim)),
        "lnf_g": jnp.ones((1, d_model), jnp.float32),
        "lnf_b": jnp.zeros((1, d_model), jnp.float32),
        "stacked": stacked,
    }


if __name__ == "__main__":
    B, S, D, H, L, E = 2, 8, 32, 4, 2, 32   # batch, seq, d_model, heads, layers, embed

    key = jax.random.PRNGKey(0)
    k_prompt, k_params = jax.random.split(key)

    prompts = jax.random.normal(k_prompt, (B, S, D), dtype=jnp.float32)

    # synthetic tokenized prompts: EOT (largest token id) at positions 5 and 7
    tokenized_prompts = jnp.array(
        [[1, 12, 33, 7, 5, 49407, 0, 0],
         [1, 9, 4, 21, 8, 17, 2, 49407]], dtype=jnp.int32)

    params = init_params(k_params, n_layers=L, seq_len=S, d_model=D, embed_dim=E)

    out = text_encoder_forward(prompts, tokenized_prompts, params, n_heads=H)
    out = jax.block_until_ready(out)

    assert out.shape == (B, E), out.shape
    assert bool(jnp.all(jnp.isfinite(out)))
    print("KERNEL_OK")
</pallas_src>

<mosaic_0001>
module attributes {stable_mosaic.version = 11 : i64} {
  func.func @_clip_layer_kernel(%arg0: i32, %arg1: i32, %arg2: memref<1x8x32xf32, #tpu.memory_space<vmem>>, %arg3: memref<8x32xf32, #tpu.memory_space<vmem>>, %arg4: memref<8x8xf32, #tpu.memory_space<vmem>>, %arg5: memref<1x1x32xf32, #tpu.memory_space<vmem>>, %arg6: memref<1x1x32xf32, #tpu.memory_space<vmem>>, %arg7: memref<1x32x96xbf16, #tpu.memory_space<vmem>>, %arg8: memref<1x1x96xf32, #tpu.memory_space<vmem>>, %arg9: memref<1x32x32xbf16, #tpu.memory_space<vmem>>, %arg10: memref<1x1x32xf32, #tpu.memory_space<vmem>>, %arg11: memref<1x1x32xf32, #tpu.memory_space<vmem>>, %arg12: memref<1x1x32xf32, #tpu.memory_space<vmem>>, %arg13: memref<1x32x128xbf16, #tpu.memory_space<vmem>>, %arg14: memref<1x1x128xf32, #tpu.memory_space<vmem>>, %arg15: memref<1x128x32xbf16, #tpu.memory_space<vmem>>, %arg16: memref<1x1x32xf32, #tpu.memory_space<vmem>>, %arg17: memref<1x8x32xf32, #tpu.memory_space<vmem>>) attributes {dimension_semantics = [#tpu.dimension_semantics<parallel>, #tpu.dimension_semantics<arbitrary>], iteration_bounds = array<i64: 2, 2>, scalar_prefetch = 0 : i64, scratch_operands = 0 : i64, tpu.core_type = #tpu.core_type<tc>, window_params = [{transform_indices = @transform_0, window_bounds = array<i64: 1, 8, 32>}, {pipeline_mode = #tpu.pipeline_mode<synchronous>, transform_indices = @transform_1, window_bounds = array<i64: 8, 32>}, {pipeline_mode = #tpu.pipeline_mode<synchronous>, transform_indices = @transform_2, window_bounds = array<i64: 8, 8>}, {transform_indices = @transform_3, window_bounds = array<i64: 1, 1, 32>}, {transform_indices = @transform_4, window_bounds = array<i64: 1, 1, 32>}, {transform_indices = @transform_5, window_bounds = array<i64: 1, 32, 96>}, {transform_indices = @transform_6, window_bounds = array<i64: 1, 1, 96>}, {transform_indices = @transform_7, window_bounds = array<i64: 1, 32, 32>}, {transform_indices = @transform_8, window_bounds = array<i64: 1, 1, 32>}, {transform_indices = @transform_9, window_bounds = array<i64: 1, 1, 32>}, {transform_indices = @transform_10, window_bounds = array<i64: 1, 1, 32>}, {transform_indices = @transform_11, window_bounds = array<i64: 1, 32, 128>}, {transform_indices = @transform_12, window_bounds = array<i64: 1, 1, 128>}, {transform_indices = @transform_13, window_bounds = array<i64: 1, 128, 32>}, {transform_indices = @transform_14, window_bounds = array<i64: 1, 1, 32>}, {transform_indices = @transform_15, window_bounds = array<i64: 1, 8, 32>}]} {
    %c0_i32 = arith.constant 0 : i32
    %0 = arith.cmpi eq, %arg1, %c0_i32 : i32
    %1 = arith.extui %0 : i1 to i32
    %c0_i32_0 = arith.constant 0 : i32
    %2 = arith.cmpi ne, %1, %c0_i32_0 : i32
    scf.if %2 {
      %c0_85 = arith.constant 0 : index
      %c0_86 = arith.constant 0 : index
      %c0_87 = arith.constant 0 : index
      %191 = vector.load %arg2[%c0_85, %c0_86, %c0_87] : memref<1x8x32xf32, #tpu.memory_space<vmem>>, vector<1x8x32xf32>
      %192 = vector.shape_cast %191 : vector<1x8x32xf32> to vector<8x32xf32>
      %c0_88 = arith.constant 0 : index
      %c0_89 = arith.constant 0 : index
      %193 = vector.load %arg3[%c0_88, %c0_89] : memref<8x32xf32, #tpu.memory_space<vmem>>, vector<8x32xf32>
      %194 = arith.addf %192, %193 : vector<8x32xf32>
      %c0_90 = arith.constant 0 : index
      %c0_91 = arith.constant 0 : index
      %c0_92 = arith.constant 0 : index
      %195 = vector.load %arg17[%c0_90, %c0_91, %c0_92] : memref<1x8x32xf32, #tpu.memory_space<vmem>>, vector<1x8x32xf32>
      %196 = vector.shape_cast %195 : vector<1x8x32xf32> to vector<8x32xf32>
      %197 = vector.shape_cast %194 : vector<8x32xf32> to vector<1x8x32xf32>
      tpu.vector_store %arg17[%c0_90, %c0_91, %c0_92], %197 {strides = array<i32>} : memref<1x8x32xf32, #tpu.memory_space<vmem>>, vector<1x8x32xf32>,
    } else {
    }
    %c0 = arith.constant 0 : index
    %c0_1 = arith.constant 0 : index
    %c0_2 = arith.constant 0 : index
    %3 = vector.load %arg17[%c0, %c0_1, %c0_2] : memref<1x8x32xf32, #tpu.memory_space<vmem>>, vector<1x8x32xf32>
    %4 = vector.shape_cast %3 : vector<1x8x32xf32> to vector<8x32xf32>
    %c0_3 = arith.constant 0 : index
    %c0_4 = arith.constant 0 : index
    %c0_5 = arith.constant 0 : index
    %5 = vector.load %arg5[%c0_3, %c0_4, %c0_5] : memref<1x1x32xf32, #tpu.memory_space<vmem>>, vector<1x1x32xf32>
    %6 = vector.shape_cast %5 : vector<1x1x32xf32> to vector<1x32xf32>
    %c0_6 = arith.constant 0 : index
    %c0_7 = arith.constant 0 : index
    %c0_8 = arith.constant 0 : index
    %7 = vector.load %arg6[%c0_6, %c0_7, %c0_8] : memref<1x1x32xf32, #tpu.memory_space<vmem>>, vector<1x1x32xf32>
    %8 = vector.shape_cast %7 : vector<1x1x32xf32> to vector<1x32xf32>
    %cst = arith.constant dense<0.000000e+00> : vector<8xf32>
    %9 = vector.multi_reduction <add>, %4, %cst [1] : vector<8x32xf32> to vector<8xf32>
    %10 = vector.shape_cast %9 : vector<8xf32> to vector<8x1xf32>
    %cst_9 = arith.constant 3.200000e+01 : f32
    %11 = vector.broadcast %cst_9 : f32 to vector<8x1xf32>
    %12 = arith.divf %10, %11 : vector<8x1xf32>
    %13 = vector.broadcast %12 : vector<8x1xf32> to vector<8x32xf32>
    %14 = arith.subf %4, %13 : vector<8x32xf32>
    %15 = arith.mulf %14, %14 : vector<8x32xf32>
    %cst_10 = arith.constant dense<0.000000e+00> : vector<8xf32>
    %16 = vector.multi_reduction <add>, %15, %cst_10 [1] : vector<8x32xf32> to vector<8xf32>
    %17 = vector.shape_cast %16 : vector<8xf32> to vector<8x1xf32>
    %cst_11 = arith.constant 3.200000e+01 : f32
    %18 = vector.broadcast %cst_11 : f32 to vector<8x1xf32>
    %19 = arith.divf %17, %18 : vector<8x1xf32>
    %cst_12 = arith.constant 9.99999974E-6 : f32
    %20 = vector.broadcast %cst_12 : f32 to vector<8x1xf32>
    %21 = arith.addf %19, %20 : vector<8x1xf32>
    %22 = math.rsqrt %21 : vector<8x1xf32>
    %23 = vector.broadcast %22 : vector<8x1xf32> to vector<8x32xf32>
    %24 = arith.mulf %14, %23 : vector<8x32xf32>
    %25 = vector.broadcast %6 : vector<1x32xf32> to vector<8x32xf32>
    %26 = arith.mulf %24, %25 : vector<8x32xf32>
    %27 = vector.broadcast %8 : vector<1x32xf32> to vector<8x32xf32>
    %28 = arith.addf %26, %27 : vector<8x32xf32>
    %29 = arith.truncf %28 : vector<8x32xf32> to vector<8x32xbf16>
    %c0_13 = arith.constant 0 : index
    %c0_14 = arith.constant 0 : index
    %c0_15 = arith.constant 0 : index
    %30 = vector.load %arg7[%c0_13, %c0_14, %c0_15] : memref<1x32x96xbf16, #tpu.memory_space<vmem>>, vector<1x32x96xbf16>
    %31 = vector.shape_cast %30 : vector<1x32x96xbf16> to vector<32x96xbf16>
    %cst_16 = arith.constant dense<0.000000e+00> : vector<8x96xf32>
    %32 = tpu.matmul %29, %31, %cst_16 {dimension_numbers = #tpu.dot_dimension_numbers<[1], [0], [0], [1], [0, 0, 1, 1], [], []>} : vector<8x32xbf16>, vector<32x96xbf16>, vector<8x96xf32> -> vector<8x96xf32>
    %c0_17 = arith.constant 0 : index
    %c0_18 = arith.constant 0 : index
    %c0_19 = arith.constant 0 : index
    %33 = vector.load %arg8[%c0_17, %c0_18, %c0_19] : memref<1x1x96xf32, #tpu.memory_space<vmem>>, vector<1x1x96xf32>
    %34 = vector.shape_cast %33 : vector<1x1x96xf32> to vector<1x96xf32>
    %35 = vector.broadcast %34 : vector<1x96xf32> to vector<8x96xf32>
    %36 = arith.addf %32, %35 : vector<8x96xf32>
    %37 = vector.extract_strided_slice %36 {offsets = [0, 0], sizes = [8, 8], strides = [1, 1]} : vector<8x96xf32> to vector<8x8xf32>
    %38 = arith.truncf %37 : vector<8x8xf32> to vector<8x8xbf16>
    %39 = vector.extract_strided_slice %36 {offsets = [0, 32], sizes = [8, 8], strides = [1, 1]} : vector<8x96xf32> to vector<8x8xf32>
    %40 = arith.truncf %39 : vector<8x8xf32> to vector<8x8xbf16>
    %41 = vector.extract_strided_slice %36 {offsets = [0, 64], sizes = [8, 8], strides = [1, 1]} : vector<8x96xf32> to vector<8x8xf32>
    %42 = arith.truncf %41 : vector<8x8xf32> to vector<8x8xbf16>
    %cst_20 = arith.constant dense<0.000000e+00> : vector<8x8xf32>
    %43 = tpu.matmul %38, %40, %cst_20 {dimension_numbers = #tpu.dot_dimension_numbers<[1], [1], [0], [0], [0, 0, 1, 0], [], []>} : vector<8x8xbf16>, vector<8x8xbf16>, vector<8x8xf32> -> vector<8x8xf32>
    %cst_21 = arith.constant 0.353553385 : f32
    %44 = vector.broadcast %cst_21 : f32 to vector<8x8xf32>
    %45 = arith.mulf %43, %44 : vector<8x8xf32>
    %c0_22 = arith.constant 0 : index
    %c0_23 = arith.constant 0 : index
    %46 = vector.load %arg4[%c0_22, %c0_23] : memref<8x8xf32, #tpu.memory_space<vmem>>, vector<8x8xf32>
    %47 = arith.addf %45, %46 : vector<8x8xf32>
    %cst_24 = arith.constant dense<0xFF800000> : vector<8xf32>
    %48 = vector.multi_reduction <maximumf>, %47, %cst_24 [1] : vector<8x8xf32> to vector<8xf32>
    %49 = vector.shape_cast %48 : vector<8xf32> to vector<8x1xf32>
    %50 = vector.broadcast %49 : vector<8x1xf32> to vector<8x8xf32>
    %51 = arith.subf %47, %50 : vector<8x8xf32>
    %52 = math.exp %51 : vector<8x8xf32>
    %cst_25 = arith.constant dense<0.000000e+00> : vector<8xf32>
    %53 = vector.multi_reduction <add>, %52, %cst_25 [1] : vector<8x8xf32> to vector<8xf32>
    %54 = vector.shape_cast %53 : vector<8xf32> to vector<8x1xf32>
    %55 = tpu.reciprocal %54 {approx = true} : vector<8x1xf32> -> vector<8x1xf32>
    %56 = vector.broadcast %55 : vector<8x1xf32> to vector<8x8xf32>
    %57 = arith.mulf %52, %56 : vector<8x8xf32>
    %58 = arith.truncf %57 : vector<8x8xf32> to vector<8x8xbf16>
    %cst_26 = arith.constant dense<0.000000e+00> : vector<8x8xf32>
    %59 = tpu.matmul %58, %42, %cst_26 {dimension_numbers = #tpu.dot_dimension_numbers<[1], [0], [0], [1], [0, 0, 1, 1], [], []>} : vector<8x8xbf16>, vector<8x8xbf16>, vector<8x8xf32> -> vector<8x8xf32>
    %60 = vector.extract_strided_slice %36 {offsets = [0, 8], sizes = [8, 8], strides = [1, 1]} : vector<8x96xf32> to vector<8x8xf32>
    %61 = arith.truncf %60 : vector<8x8xf32> to vector<8x8xbf16>
    %62 = vector.extract_strided_slice %36 {offsets = [0, 40], sizes = [8, 8], strides = [1, 1]} : vector<8x96xf32> to vector<8x8xf32>
    %63 = arith.truncf %62 : vector<8x8xf32> to vector<8x8xbf16>
    %64 = vector.extract_strided_slice %36 {offsets = [0, 72], sizes = [8, 8], strides = [1, 1]} : vector<8x96xf32> to vector<8x8xf32>
    %65 = arith.truncf %64 : vector<8x8xf32> to vector<8x8xbf16>
    %cst_27 = arith.constant dense<0.000000e+00> : vector<8x8xf32>
    %66 = tpu.matmul %61, %63, %cst_27 {dimension_numbers = #tpu.dot_dimension_numbers<[1], [1], [0], [0], [0, 0, 1, 0], [], []>} : vector<8x8xbf16>, vector<8x8xbf16>, vector<8x8xf32> -> vector<8x8xf32>
    %cst_28 = arith.constant 0.353553385 : f32
    %67 = vector.broadcast %cst_28 : f32 to vector<8x8xf32>
    %68 = arith.mulf %66, %67 : vector<8x8xf32>
    %c0_29 = arith.constant 0 : index
    %c0_30 = arith.constant 0 : index
    %69 = vector.load %arg4[%c0_29, %c0_30] : memref<8x8xf32, #tpu.memory_space<vmem>>, vector<8x8xf32>
    %70 = arith.addf %68, %69 : vector<8x8xf32>
    %cst_31 = arith.constant dense<0xFF800000> : vector<8xf32>
    %71 = vector.multi_reduction <maximumf>, %70, %cst_31 [1] : vector<8x8xf32> to vector<8xf32>
    %72 = vector.shape_cast %71 : vector<8xf32> to vector<8x1xf32>
    %73 = vector.broadcast %72 : vector<8x1xf32> to vector<8x8xf32>
    %74 = arith.subf %70, %73 : vector<8x8xf32>
    %75 = math.exp %74 : vector<8x8xf32>
    %cst_32 = arith.constant dense<0.000000e+00> : vector<8xf32>
    %76 = vector.multi_reduction <add>, %75, %cst_32 [1] : vector<8x8xf32> to vector<8xf32>
    %77 = vector.shape_cast %76 : vector<8xf32> to vector<8x1xf32>
    %78 = tpu.reciprocal %77 {approx = true} : vector<8x1xf32> -> vector<8x1xf32>
    %79 = vector.broadcast %78 : vector<8x1xf32> to vector<8x8xf32>
    %80 = arith.mulf %75, %79 : vector<8x8xf32>
    %81 = arith.truncf %80 : vector<8x8xf32> to vector<8x8xbf16>
    %cst_33 = arith.constant dense<0.000000e+00> : vector<8x8xf32>
    %82 = tpu.matmul %81, %65, %cst_33 {dimension_numbers = #tpu.dot_dimension_numbers<[1], [0], [0], [1], [0, 0, 1, 1], [], []>} : vector<8x8xbf16>, vector<8x8xbf16>, vector<8x8xf32> -> vector<8x8xf32>
    %83 = vector.extract_strided_slice %36 {offsets = [0, 16], sizes = [8, 8], strides = [1, 1]} : vector<8x96xf32> to vector<8x8xf32>
    %84 = arith.truncf %83 : vector<8x8xf32> to vector<8x8xbf16>
    %85 = vector.extract_strided_slice %36 {offsets = [0, 48], sizes = [8, 8], strides = [1, 1]} : vector<8x96xf32> to vector<8x8xf32>
    %86 = arith.truncf %85 : vector<8x8xf32> to vector<8x8xbf16>
    %87 = vector.extract_strided_slice %36 {offsets = [0, 80], sizes = [8, 8], strides = [1, 1]} : vector<8x96xf32> to vector<8x8xf32>
    %88 = arith.truncf %87 : vector<8x8xf32> to vector<8x8xbf16>
    %cst_34 = arith.constant dense<0.000000e+00> : vector<8x8xf32>
    %89 = tpu.matmul %84, %86, %cst_34 {dimension_numbers = #tpu.dot_dimension_numbers<[1], [1], [0], [0], [0, 0, 1, 0], [], []>} : vector<8x8xbf16>, vector<8x8xbf16>, vector<8x8xf32> -> vector<8x8xf32>
    %cst_35 = arith.constant 0.353553385 : f32
    %90 = vector.broadcast %cst_35 : f32 to vector<8x8xf32>
    %91 = arith.mulf %89, %90 : vector<8x8xf32>
    %c0_36 = arith.constant 0 : index
    %c0_37 = arith.constant 0 : index
    %92 = vector.load %arg4[%c0_36, %c0_37] : memref<8x8xf32, #tpu.memory_space<vmem>>, vector<8x8xf32>
    %93 = arith.addf %91, %92 : vector<8x8xf32>
    %cst_38 = arith.constant dense<0xFF800000> : vector<8xf32>
    %94 = vector.multi_reduction <maximumf>, %93, %cst_38 [1] : vector<8x8xf32> to vector<8xf32>
    %95 = vector.shape_cast %94 : vector<8xf32> to vector<8x1xf32>
    %96 = vector.broadcast %95 : vector<8x1xf32> to vector<8x8xf32>
    %97 = arith.subf %93, %96 : vector<8x8xf32>
    %98 = math.exp %97 : vector<8x8xf32>
    %cst_39 = arith.constant dense<0.000000e+00> : vector<8xf32>
    %99 = vector.multi_reduction <add>, %98, %cst_39 [1] : vector<8x8xf32> to vector<8xf32>
    %100 = vector.shape_cast %99 : vector<8xf32> to vector<8x1xf32>
    %101 = tpu.reciprocal %100 {approx = true} : vector<8x1xf32> -> vector<8x1xf32>
    %102 = vector.broadcast %101 : vector<8x1xf32> to vector<8x8xf32>
    %103 = arith.mulf %98, %102 : vector<8x8xf32>
    %104 = arith.truncf %103 : vector<8x8xf32> to vector<8x8xbf16>
    %cst_40 = arith.constant dense<0.000000e+00> : vector<8x8xf32>
    %105 = tpu.matmul %104, %88, %cst_40 {dimension_numbers = #tpu.dot_dimension_numbers<[1], [0], [0], [1], [0, 0, 1, 1], [], []>} : vector<8x8xbf16>, vector<8x8xbf16>, vector<8x8xf32> -> vector<8x8xf32>
    %106 = vector.extract_strided_slice %36 {offsets = [0, 24], sizes = [8, 8], strides = [1, 1]} : vector<8x96xf32> to vector<8x8xf32>
    %107 = arith.truncf %106 : vector<8x8xf32> to vector<8x8xbf16>
    %108 = vector.extract_strided_slice %36 {offsets = [0, 56], sizes = [8, 8], strides = [1, 1]} : vector<8x96xf32> to vector<8x8xf32>
    %109 = arith.truncf %108 : vector<8x8xf32> to vector<8x8xbf16>
    %110 = vector.extract_strided_slice %36 {offsets = [0, 88], sizes = [8, 8], strides = [1, 1]} : vector<8x96xf32> to vector<8x8xf32>
    %111 = arith.truncf %110 : vector<8x8xf32> to vector<8x8xbf16>
    %cst_41 = arith.constant dense<0.000000e+00> : vector<8x8xf32>
    %112 = tpu.matmul %107, %109, %cst_41 {dimension_numbers = #tpu.dot_dimension_numbers<[1], [1], [0], [0], [0, 0, 1, 0], [], []>} : vector<8x8xbf16>, vector<8x8xbf16>, vector<8x8xf32> -> vector<8x8xf32>
    %cst_42 = arith.constant 0.353553385 : f32
    %113 = vector.broadcast %cst_42 : f32 to vector<8x8xf32>
    %114 = arith.mulf %112, %113 : vector<8x8xf32>
    %c0_43 = arith.constant 0 : index
    %c0_44 = arith.constant 0 : index
    %115 = vector.load %arg4[%c0_43, %c0_44] : memref<8x8xf32, #tpu.memory_space<vmem>>, vector<8x8xf32>
    %116 = arith.addf %114, %115 : vector<8x8xf32>
    %cst_45 = arith.constant dense<0xFF800000> : vector<8xf32>
    %117 = vector.multi_reduction <maximumf>, %116, %cst_45 [1] : vector<8x8xf32> to vector<8xf32>
    %118 = vector.shape_cast %117 : vector<8xf32> to vector<8x1xf32>
    %119 = vector.broadcast %118 : vector<8x1xf32> to vector<8x8xf32>
    %120 = arith.subf %116, %119 : vector<8x8xf32>
    %121 = math.exp %120 : vector<8x8xf32>
    %cst_46 = arith.constant dense<0.000000e+00> : vector<8xf32>
    %122 = vector.multi_reduction <add>, %121, %cst_46 [1] : vector<8x8xf32> to vector<8xf32>
    %123 = vector.shape_cast %122 : vector<8xf32> to vector<8x1xf32>
    %124 = tpu.reciprocal %123 {approx = true} : vector<8x1xf32> -> vector<8x1xf32>
    %125 = vector.broadcast %124 : vector<8x1xf32> to vector<8x8xf32>
    %126 = arith.mulf %121, %125 : vector<8x8xf32>
    %127 = arith.truncf %126 : vector<8x8xf32> to vector<8x8xbf16>
    %cst_47 = arith.constant dense<0.000000e+00> : vector<8x8xf32>
    %128 = tpu.matmul %127, %111, %cst_47 {dimension_numbers = #tpu.dot_dimension_numbers<[1], [0], [0], [1], [0, 0, 1, 1], [], []>} : vector<8x8xbf16>, vector<8x8xbf16>, vector<8x8xf32> -> vector<8x8xf32>
    %129 = tpu.concatenate %59, %82, %105, %128 in 1 : vector<8x8xf32>, vector<8x8xf32>, vector<8x8xf32>, vector<8x8xf32> -> vector<8x32xf32>
    %130 = arith.truncf %129 : vector<8x32xf32> to vector<8x32xbf16>
    %c0_48 = arith.constant 0 : index
    %c0_49 = arith.constant 0 : index
    %c0_50 = arith.constant 0 : index
    %131 = vector.load %arg9[%c0_48, %c0_49, %c0_50] : memref<1x32x32xbf16, #tpu.memory_space<vmem>>, vector<1x32x32xbf16>
    %132 = vector.shape_cast %131 : vector<1x32x32xbf16> to vector<32x32xbf16>
    %cst_51 = arith.constant dense<0.000000e+00> : vector<8x32xf32>
    %133 = tpu.matmul %130, %132, %cst_51 {dimension_numbers = #tpu.dot_dimension_numbers<[1], [0], [0], [1], [0, 0, 1, 1], [], []>} : vector<8x32xbf16>, vector<32x32xbf16>, vector<8x32xf32> -> vector<8x32xf32>
    %c0_52 = arith.constant 0 : index
    %c0_53 = arith.constant 0 : index
    %c0_54 = arith.constant 0 : index
    %134 = vector.load %arg10[%c0_52, %c0_53, %c0_54] : memref<1x1x32xf32, #tpu.memory_space<vmem>>, vector<1x1x32xf32>
    %135 = vector.shape_cast %134 : vector<1x1x32xf32> to vector<1x32xf32>
    %136 = vector.broadcast %135 : vector<1x32xf32> to vector<8x32xf32>
    %137 = arith.addf %133, %136 : vector<8x32xf32>
    %138 = arith.addf %4, %137 : vector<8x32xf32>
    %c0_55 = arith.constant 0 : index
    %c0_56 = arith.constant 0 : index
    %c0_57 = arith.constant 0 : index
    %139 = vector.load %arg11[%c0_55, %c0_56, %c0_57] : memref<1x1x32xf32, #tpu.memory_space<vmem>>, vector<1x1x32xf32>
    %140 = vector.shape_cast %139 : vector<1x1x32xf32> to vector<1x32xf32>
    %c0_58 = arith.constant 0 : index
    %c0_59 = arith.constant 0 : index
    %c0_60 = arith.constant 0 : index
    %141 = vector.load %arg12[%c0_58, %c0_59, %c0_60] : memref<1x1x32xf32, #tpu.memory_space<vmem>>, vector<1x1x32xf32>
    %142 = vector.shape_cast %141 : vector<1x1x32xf32> to vector<1x32xf32>
    %cst_61 = arith.constant dense<0.000000e+00> : vector<8xf32>
    %143 = vector.multi_reduction <add>, %138, %cst_61 [1] : vector<8x32xf32> to vector<8xf32>
    %144 = vector.shape_cast %143 : vector<8xf32> to vector<8x1xf32>
    %cst_62 = arith.constant 3.200000e+01 : f32
    %145 = vector.broadcast %cst_62 : f32 to vector<8x1xf32>
    %146 = arith.divf %144, %145 : vector<8x1xf32>
    %147 = vector.broadcast %146 : vector<8x1xf32> to vector<8x32xf32>
    %148 = arith.subf %138, %147 : vector<8x32xf32>
    %149 = arith.mulf %148, %148 : vector<8x32xf32>
    %cst_63 = arith.constant dense<0.000000e+00> : vector<8xf32>
    %150 = vector.multi_reduction <add>, %149, %cst_63 [1] : vector<8x32xf32> to vector<8xf32>
    %151 = vector.shape_cast %150 : vector<8xf32> to vector<8x1xf32>
    %cst_64 = arith.constant 3.200000e+01 : f32
    %152 = vector.broadcast %cst_64 : f32 to vector<8x1xf32>
    %153 = arith.divf %151, %152 : vector<8x1xf32>
    %cst_65 = arith.constant 9.99999974E-6 : f32
    %154 = vector.broadcast %cst_65 : f32 to vector<8x1xf32>
    %155 = arith.addf %153, %154 : vector<8x1xf32>
    %156 = math.rsqrt %155 : vector<8x1xf32>
    %157 = vector.broadcast %156 : vector<8x1xf32> to vector<8x32xf32>
    %158 = arith.mulf %148, %157 : vector<8x32xf32>
    %159 = vector.broadcast %140 : vector<1x32xf32> to vector<8x32xf32>
    %160 = arith.mulf %158, %159 : vector<8x32xf32>
    %161 = vector.broadcast %142 : vector<1x32xf32> to vector<8x32xf32>
    %162 = arith.addf %160, %161 : vector<8x32xf32>
    %163 = arith.truncf %162 : vector<8x32xf32> to vector<8x32xbf16>
    %c0_66 = arith.constant 0 : index
    %c0_67 = arith.constant 0 : index
    %c0_68 = arith.constant 0 : index
    %164 = vector.load %arg13[%c0_66, %c0_67, %c0_68] : memref<1x32x128xbf16, #tpu.memory_space<vmem>>, vector<1x32x128xbf16>
    %165 = vector.shape_cast %164 : vector<1x32x128xbf16> to vector<32x128xbf16>
    %cst_69 = arith.constant dense<0.000000e+00> : vector<8x128xf32>
    %166 = tpu.matmul %163, %165, %cst_69 {dimension_numbers = #tpu.dot_dimension_numbers<[1], [0], [0], [1], [0, 0, 1, 1], [], []>} : vector<8x32xbf16>, vector<32x128xbf16>, vector<8x128xf32> -> vector<8x128xf32>
    %c0_70 = arith.constant 0 : index
    %c0_71 = arith.constant 0 : index
    %c0_72 = arith.constant 0 : index
    %167 = vector.load %arg14[%c0_70, %c0_71, %c0_72] : memref<1x1x128xf32, #tpu.memory_space<vmem>>, vector<1x1x128xf32>
    %168 = vector.shape_cast %167 : vector<1x1x128xf32> to vector<1x128xf32>
    %169 = vector.broadcast %168 : vector<1x128xf32> to vector<8x128xf32>
    %170 = arith.addf %166, %169 : vector<8x128xf32>
    %cst_73 = arith.constant 1.702000e+00 : f32
    %171 = vector.broadcast %cst_73 : f32 to vector<8x128xf32>
    %172 = arith.mulf %171, %170 : vector<8x128xf32>
    %173 = arith.negf %172 : vector<8x128xf32>
    %174 = math.exp %173 : vector<8x128xf32>
    %cst_74 = arith.constant 1.000000e+00 : f32
    %175 = vector.broadcast %cst_74 : f32 to vector<8x128xf32>
    %176 = arith.addf %175, %174 : vector<8x128xf32>
    %177 = arith.divf %175, %176 : vector<8x128xf32>
    %178 = arith.mulf %170, %177 : vector<8x128xf32>
    %179 = arith.truncf %178 : vector<8x128xf32> to vector<8x128xbf16>
    %c0_75 = arith.constant 0 : index
    %c0_76 = arith.constant 0 : index
    %c0_77 = arith.constant 0 : index
    %180 = vector.load %arg15[%c0_75, %c0_76, %c0_77] : memref<1x128x32xbf16, #tpu.memory_space<vmem>>, vector<1x128x32xbf16>
    %181 = vector.shape_cast %180 : vector<1x128x32xbf16> to vector<128x32xbf16>
    %cst_78 = arith.constant dense<0.000000e+00> : vector<8x32xf32>
    %182 = tpu.matmul %179, %181, %cst_78 {dimension_numbers = #tpu.dot_dimension_numbers<[1], [0], [0], [1], [0, 0, 1, 1], [], []>} : vector<8x128xbf16>, vector<128x32xbf16>, vector<8x32xf32> -> vector<8x32xf32>
    %c0_79 = arith.constant 0 : index
    %c0_80 = arith.constant 0 : index
    %c0_81 = arith.constant 0 : index
    %183 = vector.load %arg16[%c0_79, %c0_80, %c0_81] : memref<1x1x32xf32, #tpu.memory_space<vmem>>, vector<1x1x32xf32>
    %184 = vector.shape_cast %183 : vector<1x1x32xf32> to vector<1x32xf32>
    %185 = vector.broadcast %184 : vector<1x32xf32> to vector<8x32xf32>
    %186 = arith.addf %182, %185 : vector<8x32xf32>
    %187 = arith.addf %138, %186 : vector<8x32xf32>
    %c0_82 = arith.constant 0 : index
    %c0_83 = arith.constant 0 : index
    %c0_84 = arith.constant 0 : index
    %188 = vector.load %arg17[%c0_82, %c0_83, %c0_84] : memref<1x8x32xf32, #tpu.memory_space<vmem>>, vector<1x8x32xf32>
    %189 = vector.shape_cast %188 : vector<1x8x32xf32> to vector<8x32xf32>
    %190 = vector.shape_cast %187 : vector<8x32xf32> to vector<1x8x32xf32>
    tpu.vector_store %arg17[%c0_82, %c0_83, %c0_84], %190 {strides = array<i32>} : memref<1x8x32xf32, #tpu.memory_space<vmem>>, vector<1x8x32xf32>,
    return
  }
  func.func @transform_0(%arg0: i32, %arg1: i32) -> (i32, i32, i32) {
    %c0_i32 = arith.constant 0 : i32
    %c0_i32_0 = arith.constant 0 : i32
    %c0_i32_1 = arith.constant 0 : i32
    return %arg0, %c0_i32, %c0_i32_0 : i32, i32, i32
  }
  func.func @transform_1(%arg0: i32, %arg1: i32) -> (i32, i32) {
    %c0_i32 = arith.constant 0 : i32
    %c0_i32_0 = arith.constant 0 : i32
    %c0_i32_1 = arith.constant 0 : i32
    return %c0_i32, %c0_i32_0 : i32, i32
  }
  func.func @transform_2(%arg0: i32, %arg1: i32) -> (i32, i32) {
    %c0_i32 = arith.constant 0 : i32
    %c0_i32_0 = arith.constant 0 : i32
    %c0_i32_1 = arith.constant 0 : i32
    return %c0_i32, %c0_i32_0 : i32, i32
  }
  func.func @transform_3(%arg0: i32, %arg1: i32) -> (i32, i32, i32) {
    %c0_i32 = arith.constant 0 : i32
    %c0_i32_0 = arith.constant 0 : i32
    %c0_i32_1 = arith.constant 0 : i32
    return %arg1, %c0_i32, %c0_i32_0 : i32, i32, i32
  }
  func.func @transform_4(%arg0: i32, %arg1: i32) -> (i32, i32, i32) {
    %c0_i32 = arith.constant 0 : i32
    %c0_i32_0 = arith.constant 0 : i32
    %c0_i32_1 = arith.constant 0 : i32
    return %arg1, %c0_i32, %c0_i32_0 : i32, i32, i32
  }
  func.func @transform_5(%arg0: i32, %arg1: i32) -> (i32, i32, i32) {
    %c0_i32 = arith.constant 0 : i32
    %c0_i32_0 = arith.constant 0 : i32
    %c0_i32_1 = arith.constant 0 : i32
    return %arg1, %c0_i32, %c0_i32_0 : i32, i32, i32
  }
  func.func @transform_6(%arg0: i32, %arg1: i32) -> (i32, i32, i32) {
    %c0_i32 = arith.constant 0 : i32
    %c0_i32_0 = arith.constant 0 : i32
    %c0_i32_1 = arith.constant 0 : i32
    return %arg1, %c0_i32, %c0_i32_0 : i32, i32, i32
  }
  func.func @transform_7(%arg0: i32, %arg1: i32) -> (i32, i32, i32) {
    %c0_i32 = arith.constant 0 : i32
    %c0_i32_0 = arith.constant 0 : i32
    %c0_i32_1 = arith.constant 0 : i32
    return %arg1, %c0_i32, %c0_i32_0 : i32, i32, i32
  }
  func.func @transform_8(%arg0: i32, %arg1: i32) -> (i32, i32, i32) {
    %c0_i32 = arith.constant 0 : i32
    %c0_i32_0 = arith.constant 0 : i32
    %c0_i32_1 = arith.constant 0 : i32
    return %arg1, %c0_i32, %c0_i32_0 : i32, i32, i32
  }
  func.func @transform_9(%arg0: i32, %arg1: i32) -> (i32, i32, i32) {
    %c0_i32 = arith.constant 0 : i32
    %c0_i32_0 = arith.constant 0 : i32
    %c0_i32_1 = arith.constant 0 : i32
    return %arg1, %c0_i32, %c0_i32_0 : i32, i32, i32
  }
  func.func @transform_10(%arg0: i32, %arg1: i32) -> (i32, i32, i32) {
    %c0_i32 = arith.constant 0 : i32
    %c0_i32_0 = arith.constant 0 : i32
    %c0_i32_1 = arith.constant 0 : i32
    return %arg1, %c0_i32, %c0_i32_0 : i32, i32, i32
  }
  func.func @transform_11(%arg0: i32, %arg1: i32) -> (i32, i32, i32) {
    %c0_i32 = arith.constant 0 : i32
    %c0_i32_0 = arith.constant 0 : i32
    %c0_i32_1 = arith.constant 0 : i32
    return %arg1, %c0_i32, %c0_i32_0 : i32, i32, i32
  }
  func.func @transform_12(%arg0: i32, %arg1: i32) -> (i32, i32, i32) {
    %c0_i32 = arith.constant 0 : i32
    %c0_i32_0 = arith.constant 0 : i32
    %c0_i32_1 = arith.constant 0 : i32
    return %arg1, %c0_i32, %c0_i32_0 : i32, i32, i32
  }
  func.func @transform_13(%arg0: i32, %arg1: i32) -> (i32, i32, i32) {
    %c0_i32 = arith.constant 0 : i32
    %c0_i32_0 = arith.constant 0 : i32
    %c0_i32_1 = arith.constant 0 : i32
    return %arg1, %c0_i32, %c0_i32_0 : i32, i32, i32
  }
  func.func @transform_14(%arg0: i32, %arg1: i32) -> (i32, i32, i32) {
    %c0_i32 = arith.constant 0 : i32
    %c0_i32_0 = arith.constant 0 : i32
    %c0_i32_1 = arith.constant 0 : i32
    return %arg1, %c0_i32, %c0_i32_0 : i32, i32, i32
  }
  func.func @transform_15(%arg0: i32, %arg1: i32) -> (i32, i32, i32) {
    %c0_i32 = arith.constant 0 : i32
    %c0_i32_0 = arith.constant 0 : i32
    %c0_i32_1 = arith.constant 0 : i32
    return %arg0, %c0_i32, %c0_i32_0 : i32, i32, i32
  }
}

</mosaic_0001>

<bundles_post_ra>
// kernel: tpu_custom_call.1
= control target key start
LH: loop header
LB: loop body
LE: loop exit
PB: predicated region body
PF: predicated region fallthrough
CT: control target
= control target key end

     0   :  { %s2624_s0 = inlined_call_operand.vmem [shape: f32[2,8,32], index: 0, kind: input, shape index: {}]   ;;  %s2625_s1 = inlined_call_operand.vmem [shape: f32[8,32], index: 1, kind: input, shape index: {}]   ;;  %s2626_s2 = inlined_call_operand.vmem [shape: f32[8,8], index: 2, kind: input, shape index: {}]   ;;  %s2627_s3 = inlined_call_operand.vmem [shape: f32[2,1,32], index: 3, kind: input, shape index: {}]   ;;  %s2628_s4 = inlined_call_operand.vmem [shape: f32[2,1,32], index: 4, kind: input, shape index: {}]   ;;  %s2629_s5 = inlined_call_operand.vmem [shape: bf16[2,32,96], index: 5, kind: input, shape index: {}]   ;;  %s2630_s6 = inlined_call_operand.vmem [shape: f32[2,1,96], index: 6, kind: input, shape index: {}]   ;;  %s2631_s7 = inlined_call_operand.vmem [shape: bf16[2,32,32], index: 7, kind: input, shape index: {}]   ;;  %s2632_s8 = inlined_call_operand.vmem [shape: f32[2,1,32], index: 8, kind: input, shape index: {}]   ;;  %s2633_s9 = inlined_call_operand.vmem [shape: f32[2,1,32], index: 9, kind: input, shape index: {}]   ;;  %s2634_s10 = inlined_call_operand.vmem [shape: f32[2,1,32], index: 10, kind: input, shape index: {}]   ;;  %s2635_s11 = inlined_call_operand.vmem [shape: bf16[2,32,128], index: 11, kind: input, shape index: {}]   ;;  %s2636_s12 = inlined_call_operand.vmem [shape: f32[2,1,128], index: 12, kind: input, shape index: {}]   ;;  %s2637_s13 = inlined_call_operand.vmem [shape: bf16[2,128,32], index: 13, kind: input, shape index: {}]   ;;  %s2638_s14 = inlined_call_operand.vmem [shape: f32[2,1,32], index: 14, kind: input, shape index: {}]   ;;  %s2639_s15 = inlined_call_operand.hbm [shape: f32[2,8,32], index: 15, kind: output, shape index: {}]  }
   0x1   :  { %2655 = sst [smem:[#allocation18_spill]] %s2624_s0 }
   0x2   :  { %2656 = sst [smem:[#allocation19_spill]] %s2625_s1 }
   0x3   :  { %2657 = sst [smem:[#allocation20_spill]] %s2626_s2 }
   0x4   :  { %2658 = sst [smem:[#allocation21_spill]] %s2629_s5 }
   0x5   :  { %2659 = sst [smem:[#allocation22_spill]] %s2631_s7 }
   0x6   :  { %2660 = sst [smem:[#allocation23_spill]] %s2633_s9 }
   0x7   :  { %2661 = sst [smem:[#allocation24_spill]] %s2637_s13 }
   0x8   :  { %2662 = sst [smem:[#allocation25_spill]] %s2639_s15 }
   0x9   :  { %20 = vsyncpa [#allocation3], 0 }
   0xa   :  { %22 = vsyncpa [#allocation3 + $0x1], 0  ;;  %s2261_s18 = smov 0   ;;  %s2263_s19 = smov 0  }
   0xb   :  { %s2265_s20 = smov 0   ;;  %s2267_s21 = smov 0  }
   0xc   :  { %s2269_s22 = smov 0   ;;  %s2271_s23 = smov 0  }
   0xd   :  { %s2273_s24 = smov 0   ;;  %s2275_s25 = smov 0  }
   0xe LB: > { %2663 = sst [smem:[#allocation5_spill]] %s2134_s18  ;;  %s1761_s26 = sadd.s32 4294967295, %s2162_s25   ;;  %s2162_s25 = sphi %s2275_s25, %s28_s25   ;;  %s2158_s24 = sphi %s2273_s24, %s2706_s24   ;;  %s2154_s23 = sphi %s2271_s23, %s2705_s23   ;;  %s2150_s22 = sphi %s2269_s22, %s2704_s22   ;;  %s2146_s21 = sphi %s2267_s21, %s2703_s21   ;;  %s2142_s20 = sphi %s2265_s20, %s2702_s20   ;;  %s2138_s19 = sphi %s2263_s19, %s2701_s19   ;;  %s2134_s18 = sphi %s2261_s18, %s2700_s18  }
   0xf   : > { %2664 = sst [smem:[#allocation6_spill]] %s2138_s19  ;;  %s1762_s27 = sadd.s32 4294967294, %s2162_s25  }
  0x10   : > { %2665 = sst [smem:[#allocation7_spill]] %s2142_s20  ;;  %s37_s28 = sadd.s32 1, %s2154_s23 }
  0x11   : > { %2666 = sst [smem:[#allocation8_spill]] %s2146_s21  ;;  %p38_p0 = scmp.ge.s32.totalorder %s37_s28, 2 }
  0x12   : > { %2667 = sst [smem:[#allocation9_spill]] %s2150_s22  ;;  %s40_s29 = sadd.s32 1, %s2158_s24 }
  0x13   : > { %2668 = sst [smem:[#allocation10_spill]] %s2154_s23  ;;  %p437_p1 = scmp.ne.s32.totalorder %s2142_s20, %s2138_s19 }
  0x14   : > { %2669 = sst [smem:[#allocation11_spill]] %s2158_s24  ;;  %p438_p2 = scmp.eq.s32.totalorder %s1761_s26, 3 }
  0x15   : > { %2670 = sst [smem:[#allocation12_spill]] %s2162_s25  ;;  %s2708_s28 = smov (%p38_p0, %s37_s28), 0 }
  0x16   : > { %2671 = sst [smem:[#allocation13_spill]] %s2708_s28  ;;  %s2710_s29 = smov (!%p38_p0, %s40_s29), %s2158_s24 }
  0x17   : > { %p2310_p3 = por %p438_p2, %p437_p1  ;;  %p443_p4 = scmp.ne.s32.totalorder %s2138_s19, %s2134_s18 }
  0x18   : > { %p42_p5 = scmp.ge.s32.totalorder %s2710_s29, 2  ;;  %p444_p6 = scmp.eq.s32.totalorder %s1762_s27, 3 }
  0x19   : > { %s2672_s30 = scalar_select %p2310_p3, 1, 0 }
  0x1a   : > { %p1765_p7 = scmp.ge.s32.totalorder %s2162_s25, 1  ;;  %p555_p8 = scmp.lt.s32.totalorder %s2162_s25, 5 }
  0x1b   : > { %2673 = sst [smem:[#allocation14_spill]] %s2672_s30  ;;  %s2712_s29 = smov (%p42_p5, %s2710_s29), 0 }
  0x1c   : > { %2674 = sst [smem:[#allocation15_spill]] %s2712_s29  ;;  %p2320_p9 = por %p444_p6, %p443_p4 }
  0x1d   : > { %p556_p10 = pnand %p1765_p7, %p555_p8  ;;  %s424_s17 = ssub.s32 %s2158_s24, %s2712_s29 }
  0x1e   : > { %s2675_s16 = scalar_select %p2320_p9, 1, 0 }
  0x1f   : > { %s427_s26 = sadd.s32 1, %s2142_s20  ;;  %p425_p11 = scmp.eq.s32.totalorder %s424_s17, 0 }
  0x20   : > { %2676 = sst [smem:[#allocation16_spill]] %s2675_s16  ;;  %559 = sbr.rel (%p556_p10) target bundleno = 2533 (0x9e5), region = 80 }
  0x21   : > { %s2328_s28 = scalar_select %p425_p11, %s2142_s20, %s427_s26  }
  0x22   : > { %s2645_s27 = sand.u32 (!%p556_p10), 1, %s2138_s19   ;;  %p646_p12 = scmp.lt.s32.totalorder (!%p556_p10), %s2150_s22, 1 }
  0x23   : > { %2677 = sst [smem:[#allocation17_spill]] %s2328_s28  ;;  %s1766_s23 = sshll.u32 (!%p556_p10), %s2645_s27, 3 }
  0x24   : > { %p650_p13 = scmp.lt.s32.totalorder (!%p556_p10), %s2146_s21, 1  ;;  %s2678_s0 = sld [smem:[#allocation18_spill]] (!%p556_p10) }
  0x25   : > { %s647_s18 = scalar_select %p646_p12, %s2150_s22, 1 }
  0x26   : > { %s2337_s16 = scalar_select %p650_p13, %s2146_s21, 1 }
  0x27   : > { %s1767_s17 = sshll.u32 %s647_s18, 3  ;;  %s2679_s5 = sld [smem:[#allocation21_spill]] }
  0x28   : > { %s1815_s19 = sshll.u32 %s2337_s16, 4  ;;  %s2680_s7 = sld [smem:[#allocation22_spill]] }
  0x29   : > { %s2380_s18 = scalar_lea.vmem %s2635_s11, %s1815_s19  ;;  %s685_s13 = scalar_lea.vmem %s2636_s12, %s2337_s16 }
  0x2a   : > { %s649_s24 = scalar_lea.vmem %s2678_s0, %s1767_s17  ;;  %s677_s0 = scalar_lea.vmem %s2634_s10, %s2337_s16 }
  0x2b   : > { %s693_s15 = scalar_lea.vmem %s2638_s14, %s2337_s16  ;;  %s2682_s20 = sld [smem:[#allocation24_spill]] }
  0x2c   : > { %s2396_s2 = scalar_lea.vmem [#allocation2], %s1766_s23  ;;  %s2683_s22 = sld [smem:[#allocation8_spill]] }
  0x2d   : > { %s2354_s1 = scalar_lea.vmem %s2679_s5, %s1815_s19 }
  0x2e   : > { %s2363_s26 = scalar_lea.vmem %s2680_s7, %s1815_s19  ;;  %s1818_s7 = sshll.u32 %s2337_s16, 6 }
  0x31   : > { %s2394_s9 = scalar_lea.vmem %s2682_s20, %s1818_s7 }
  0x32   : > { %p1776_p0 = scmp.ne.s32.totalorder %s2683_s22, 0 }
  0x33   : > { %s2684_s21 = sld [smem:[#allocation19_spill]] (!%p1776_p0) }
  0x34   : > { %698 = sbr.rel (%p1776_p0) target bundleno = 62 (0x3e), region = 84 }
  0x39   : > { %v699_v0 = vld [vmem:[%s649_s24] sm:$0xff]  ;;  %vm702_vm0 = vcmask 261120  }
  0x3a   : > { %v700_v1 = vld [vmem:[%s2684_s21] sm:$0xff] }
  0x3b   : > { %v701_v2 = vadd.f32 %v700_v1, %v699_v0 }
  0x3d   : > { %703 = vst.msk [vmem:[%s2396_s2] sm:$0xff] %vm702_vm0, %v701_v2 }
  0x3e PF: > { %vm707_vm1 = vcmask 261120   ;;  %v2032_v10 = vld [vmem:[%s2354_s1 + $0x8] sm:$0xff]   ;;  %v2164_v11 = vmov 0.0   ;;  %vm2165_vm2 = vmmov 0   ;;  %v2033_v12 = vld [vmem:[%s2354_s1] sm:$0xff]   ;;  %s2685_s1 = scalar_lea.vmem %s2627_s3, %s2337_s16  ;;  %s2686_s29 = scalar_lea.vmem %s2628_s4, %s2337_s16  ;;  %vm807_vm3 = vcmask 64512  }
  0x3f   : > { %1853 = vmatprep.subr.bf16.mxu0 %v2164_v11  ;;  %1857 = vmatprep.mubr.msk.bf16.mxu0 %vm2165_vm2, %v2164_v11  ;;  %v1777_v17 = vld [vmem:[%s2685_s1] ss:$0 sm:$0xff]  ;;  %s2687_s27 = scalar_lea.vmem %s2630_s6, %s2337_s16  ;;  %s2166_s30 = smov 120   ;;  %vm874_vm4 = vcmask 1043456   ;;  %vm1267_vm5 = vcmask 130048   ;;  %vm1269_vm6 = vcmask 195584  }
  0x40   : > { %1854 = vmatpush3.bf16.msra.mxu0 %v2032_v10  ;;  %1873 = vmatprep.subr.bf16.mxu1 %v2164_v11  ;;  %v1778_v19 = vld [vmem:[%s2686_s29] ss:$0 sm:$0xff]  ;;  %s2167_s25 = smov 96   ;;  %s2168_s22 = smov 88  }
  0x41   : > { %1855 = vmatprep.subr.bf16.mxu0 %v2164_v11  ;;  %1875 = vmatprep.mubr.msk.bf16.mxu1 %vm2165_vm2, %v2164_v11  ;;  %v1779_v23 = vld [vmem:[%s2687_s27] ss:$0 sm:$0xff]  ;;  %s2169_s5 = smov 80   ;;  %s2170_s19 = smov 112  }
  0x42   : > { %s2171_s21 = smov 72   ;;  %s2172_s7 = smov 104  }
  0x43   : > { %s2688_s23 = sld [smem:[#allocation20_spill]]  ;;  %s2173_s24 = smov 64  }
  0x44   : > { %v2404_v3 = vld [vmem:[%s2396_s2] sm:$0xff]  ;;  %1856 = vmatpush3.bf16.msra.mxu0 %v2033_v12  ;;  %s2174_s29 = smov 56   ;;  %s2175_s17 = smov 48  }
  0x45   : > { %v708_v4 = vsel %vm707_vm1, %v2404_v3, 0.0  ;;  %1861 = vmatprep.subr.bf16.mxu0 %v2164_v11  ;;  %s2176_s28 = smov 40   ;;  %s2177_s27 = smov 8  }
  0x46   : > { %709 = vadd.xlane.f32.xlu0 %v708_v4 }
  0x49   : > { %v855_v42 = vld [vmem:[%s2688_s23] sm:$0xff] }
  0xcf   : > { %v710_v5 = vpop.xlane.xlu0 %709 }
  0xd0   : > { %v712_v6 = vmul.f32 0.03125, %v710_v5 }
  0xd2   : > { %v713_v7 = vsub.f32 %v2404_v3, %v712_v6 }
  0xd4   : > { %v714_v8 = vmul.f32 %v713_v7, %v713_v7 }
  0xd6   : > { %v715_v9 = vsel %vm707_vm1, %v714_v8, 0.0 }
  0xd7   : > { %716 = vadd.xlane.f32.xlu0 %v715_v9 }
 0x160   : > { %v717_v13 = vpop.xlane.xlu0 %716 }
 0x161   : > { %v718_v14 = vmul.f32 0.03125, %v717_v13 }
 0x163   : > { %v719_v15 = vadd.f32 1e-05, %v718_v14 }
 0x165   : > { %2046 = vrsqrt.f32 %v719_v15 }
 0x172   : > { %v2047_v16 = vpop.eup %2046 }
 0x173   : > { %v721_v18 = vmul.f32 %v2047_v16, %v713_v7 }
 0x175   : > { %v728_v20 = vmul.f32 %v1777_v17, %v721_v18 }
 0x177   : > { %v735_v21 = vadd.f32 %v1778_v19, %v728_v20 }
 0x179   : > { %v736_v22 = vpack.c.bf16 %v735_v21, %v735_v21 }
 0x17b   : > { %1858 = vmatmul.mubr.msk.bf16.vlgmr.msra.gmra.mxu0 %vm707_vm1, %v736_v22 }
 0x17c   : > { %1863 = vmatprep.mubr.msk.bf16.mxu0 %vm2165_vm2, %v2164_v11 }
 0x23b   : > { %v797_v24 = vpop.f32.mrf.mxu0 }
 0x23c   : > { %v798_v25 = vadd.f32 %v1779_v23, %v797_v24 }
 0x23d   : > { %v1859_v26 = vpop.f32.mrf.mxu0 }
 0x23e   : > { %v2438_v27 = vpack.c.bf16 %v798_v25, %v798_v25 }
 0x23f   : > { %v800_v28 = vpop.f32.mrf.mxu0 }
 0x240   : > { %918 = vrot.lane.b32.xlu0 %v2438_v27, %s2166_s30  ;;  %805 = vrot.lane.b32.xlu1 %v2438_v27, %s2167_s25  ;;  %s2178_s30 = smov 16   ;;  %s2179_s25 = smov 24  }
 0x241   : > { %v1860_v29 = vpop.f32.mrf.mxu0 }
 0x244   : > { %920 = vrot.lane.b32.xlu1 %v2438_v27, %s2168_s22 }
 0x248   : > { %1032 = vrot.lane.b32.xlu1 %v2438_v27, %s2169_s5  ;;  %s2689_s5 = scalar_lea.vmem %s2632_s8, %s2337_s16 }
 0x24c   : > { %1030 = vrot.lane.b32.xlu1 %v2438_v27, %s2170_s19  ;;  %s2180_s19 = smov [#allocation2]  }
 0x250   : > { %1144 = vrot.lane.b32.xlu1 %v2438_v27, %s2171_s21  ;;  %s2074_s21 = sshll.u32 %s2180_s19, 4  ;;  %s2075_s21 = int_to_ptr.vmem [resolvable:$false] %s2074_s21 }
 0x254   : > { %1142 = vrot.lane.b32.xlu1 %v2438_v27, %s2172_s7  ;;  %s2690_s7 = sld [smem:[#allocation23_spill]] }
 0x25a   : > { %s2691_s20 = scalar_lea.vmem %s2690_s7, %s2337_s16  ;;  %s2076_s7 = scalar_lea.vmem %s2075_s21, 256 }
 0x2b2   : > { %v806_v30 = vpop.permute.xlu1 %805  ;;  %v919_v35 = vpop.permute.xlu0 %918 }
 0x2b3   : > { %v812_v31 = vsel %vm807_vm3, %v806_v30, 0 }
 0x2b4   : > { %1862 = vmatpush3.bf16.xpose.msra.mxu0 %v812_v31 }
 0x2b5   : > { %1867 = vmatprep.subr.bf16.mxu0 %v2164_v11 }
 0x2b6   : > { %v921_v32 = vpop.permute.xlu1 %920 }
 0x2b7   : > { %v926_v33 = vsel %vm807_vm3, %v921_v32, 0 }
 0x2b8   : > { %1874 = vmatpush3.bf16.xpose.msra.mxu1 %v926_v33 }
 0x2b9   : > { %1885 = vmatprep.subr.bf16.mxu1 %v2164_v11 }
 0x2ba   : > { %v1033_v34 = vpop.permute.xlu1 %1032 }
 0x2bb   : > { %1864 = vmatmul.mubr.msk.bf16.vlgmr.msra.gmra.mxu0 %vm807_vm3, %v2438_v27  ;;  %v1038_v37 = vsel %vm807_vm3, %v1033_v34, 0 }
 0x2bc   : > { %1869 = vmatprep.mubr.msk.bf16.mxu0 %vm2165_vm2, %v2164_v11 }
 0x2be   : > { %v1031_v36 = vpop.permute.xlu1 %1030 }
 0x2bf   : > { %1876 = vmatmul.mubr.msk.bf16.vlgmr.msra.gmra.mxu1 %vm807_vm3, %v919_v35 }
 0x2c0   : > { %1886 = vmatpush3.bf16.xpose.msra.mxu1 %v1038_v37  ;;  %1887 = vmatprep.mubr.msk.bf16.mxu1 %vm2165_vm2, %v2164_v11 }
 0x2c1   : > { %1897 = vmatprep.subr.bf16.mxu1 %v2164_v11 }
 0x2c2   : > { %v1145_v38 = vpop.permute.xlu1 %1144 }
 0x2c3   : > { %v1150_v39 = vsel %vm807_vm3, %v1145_v38, 0 }
 0x2c6   : > { %v1143_v40 = vpop.permute.xlu1 %1142 }
 0x2c7   : > { %1888 = vmatmul.mubr.msk.bf16.vlgmr.msra.gmra.mxu1 %vm807_vm3, %v1031_v36 }
 0x2c8   : > { %1898 = vmatpush3.bf16.xpose.msra.mxu1 %v1150_v39  ;;  %1899 = vmatprep.mubr.msk.bf16.mxu1 %vm2165_vm2, %v2164_v11 }
 0x2c9   : > { %1909 = vmatprep.subr.bf16.mxu1 %v2164_v11 }
 0x2cf   : > { %1900 = vmatmul.mubr.msk.bf16.vlgmr.msra.gmra.mxu1 %vm807_vm3, %v1143_v40 }
 0x2d0   : > { %1913 = vmatprep.mubr.msk.bf16.mxu1 %vm2165_vm2, %v2164_v11 }
 0x37b   : > { %v848_v41 = vpop.f32.mrf.mxu0 }
 0x37c   : > { %v854_v43 = vmul.f32 0.35355338, %v848_v41 }
 0x37d   : > { %v1865_v44 = vpop.f32.mrf.mxu0 }
 0x37e   : > { %v856_v45 = vadd.f32 %v855_v42, %v854_v43 }
 0x37f   : > { %v851_v46 = vpop.f32.mrf.mxu0  ;;  %v962_v47 = vpop.f32.mrf.mxu1 }
 0x380   : > { %v968_v48 = vmul.f32 0.35355338, %v962_v47  ;;  %v857_v49 = vsel %vm807_vm3, %v856_v45, -inf }
 0x381   : > { %v1877_v50 = vpop.f32.mrf.mxu1  ;;  %858 = vmax.xlane.f32.xlu1 %v857_v49  ;;  %v1866_v51 = vpop.f32.mrf.mxu0 }
 0x382   : > { %v969_v52 = vadd.f32 %v968_v48, %v855_v42 }
 0x383   : > { %v965_v53 = vpop.f32.mrf.mxu1 }
 0x384   : > { %v970_v54 = vsel %vm807_vm3, %v969_v52, -inf }
 0x385   : > { %971 = vmax.xlane.f32.xlu0 %v970_v54  ;;  %v1878_v55 = vpop.f32.mrf.mxu1 }
 0x387   : > { %v1074_v56 = vpop.f32.mrf.mxu1 }
 0x388   : > { %v1080_v57 = vmul.f32 0.35355338, %v1074_v56 }
 0x389   : > { %v1889_v58 = vpop.f32.mrf.mxu1 }
 0x38a   : > { %v1081_v59 = vadd.f32 %v1080_v57, %v855_v42 }
 0x38b   : > { %v1077_v60 = vpop.f32.mrf.mxu1 }
 0x38c   : > { %v1082_v61 = vsel %vm807_vm3, %v1081_v59, -inf  ;;  %v2034_v60 = vld [vmem:[%s2363_s26 + $0x8] sm:$0xff]  }
 0x38d   : > { %v1890_v62 = vpop.f32.mrf.mxu1  ;;  %1083 = vmax.xlane.f32.xlu1 %v1082_v61  ;;  %1910 = vmatpush3.bf16.msra.mxu1 %v2034_v60  ;;  %v2035_v61 = vld [vmem:[%s2363_s26] sm:$0xff]   ;;  %s2695_s26 = sld [smem:[#allocation25_spill]] }
 0x38e   : > { %1911 = vmatprep.subr.bf16.mxu1 %v2164_v11 }
 0x38f   : > { %v1186_v63 = vpop.f32.mrf.mxu1 }
 0x390   : > { %v1192_v0 = vmul.f32 0.35355338, %v1186_v63 }
 0x391   : > { %v1901_v1 = vpop.f32.mrf.mxu1  ;;  %1912 = vmatpush3.bf16.msra.mxu1 %v2035_v61 }
 0x392   : > { %v1193_v2 = vadd.f32 %v1192_v0, %v855_v42  ;;  %1925 = vmatprep.subr.bf16.mxu1 %v2164_v11 }
 0x393   : > { %v1189_v4 = vpop.f32.mrf.mxu1 }
 0x394   : > { %v1194_v5 = vsel %vm807_vm3, %v1193_v2, -inf }
 0x395   : > { %1195 = vmax.xlane.f32.xlu0 %v1194_v5  ;;  %v1902_v6 = vpop.f32.mrf.mxu1 }
 0x40a   : > { %v859_v7 = vpop.xlane.xlu1 %858 }
 0x40b   : > { %v860_v8 = vsub.f32 %v856_v45, %v859_v7 }
 0x40d   : > { %v861_v9 = vmul.f32 1.442695, %v860_v8 }
 0x40e   : > { %v972_v10 = vpop.xlane.xlu0 %971 }
 0x40f   : > { %2048 = vpow2.f32 %v861_v9  ;;  %v973_v12 = vsub.f32 %v969_v52, %v972_v10 }
 0x411   : > { %v974_v13 = vmul.f32 1.442695, %v973_v12 }
 0x413   : > { %2050 = vpow2.f32 %v974_v13 }
 0x416   : > { %v1084_v23 = vpop.xlane.xlu1 %1083 }
 0x417   : > { %v1085_v24 = vsub.f32 %v1081_v59, %v1084_v23 }
 0x419   : > { %v1086_v25 = vmul.f32 1.442695, %v1085_v24 }
 0x41c   : > { %v2049_v14 = vpop.eup %2048 }
 0x41d   : > { %v863_v15 = vsel %vm807_vm3, %v2049_v14, 0.0 }
 0x41e   : > { %v1196_v16 = vpop.xlane.xlu0 %1195  ;;  %864 = vadd.xlane.f32.xlu1 %v863_v15  ;;  %v1791_v15 = vld [vmem:[%s2689_s5] ss:$0 sm:$0xff] }
 0x41f   : > { %v1197_v17 = vsub.f32 %v1193_v2, %v1196_v16 }
 0x420   : > { %v2051_v18 = vpop.eup %2050 }
 0x421   : > { %v1198_v19 = vmul.f32 1.442695, %v1197_v17  ;;  %v976_v20 = vsel %vm807_vm3, %v2051_v18, 0.0 }
 0x422   : > { %977 = vadd.xlane.f32.xlu0 %v976_v20 }
 0x423   : > { %2052 = vpow2.f32 %v1198_v19 }
 0x424   : > { %2054 = vpow2.f32 %v1086_v25 }
 0x42f   : > { %869 = vrot.lane.b32.xlu1 %v2438_v27, %s2173_s24  ;;  %s2692_s24 = sld [smem:[#allocation9_spill]] }
 0x430   : > { %v2053_v21 = vpop.eup %2052 }
 0x431   : > { %v1200_v22 = vsel %vm807_vm3, %v2053_v21, 0.0  ;;  %v2055_v26 = vpop.eup %2054 }
 0x432   : > { %1201 = vadd.xlane.f32.xlu0 %v1200_v22  ;;  %v1088_v28 = vsel %vm807_vm3, %v2055_v26, 0.0 }
 0x448   : > { %982 = vrot.lane.b32.xlu0 %v2438_v27, %s2174_s29 }
 0x453   : > { %1089 = vadd.xlane.f32.xlu1 %v1088_v28 }
 0x464   : > { %1094 = vrot.lane.b32.xlu1 %v2438_v27, %s2175_s17 }
 0x468   : > { %1206 = vrot.lane.b32.xlu1 %v2438_v27, %s2176_s28  ;;  %s1812_s28 = sshll.u32 %s2692_s24, 7 }
 0x469   : > { %s2568_s22 = scalar_lea.hbm %s2695_s26, %s1812_s28 }
 0x4a7   : > { %v865_v29 = vpop.xlane.xlu1 %864 }
 0x4a8   : > { %2056 = vrcp.f32 %v865_v29  ;;  %v2036_v29 = vld [vmem:[%s2380_s18 + $0x8] sm:$0xff]  }
 0x4ab   : > { %v978_v30 = vpop.xlane.xlu0 %977  ;;  %v870_v31 = vpop.permute.xlu1 %869 }
 0x4ac   : > { %v876_v32 = vsel %vm874_vm4, %v870_v31, 0  ;;  %2058 = vrcp.f32 %v978_v30 }
 0x4ad   : > { %1868 = vmatpush3.bf16.msra.mxu0 %v876_v32 }
 0x4ae   : > { %1879 = vmatprep.subr.bf16.mxu0 %v2164_v11 }
 0x4b5   : > { %v2057_v33 = vpop.eup %2056 }
 0x4b6   : > { %v867_v34 = vmul.f32 %v2057_v33, %v2049_v14 }
 0x4b8   : > { %v868_v35 = vpack.c.bf16 %v867_v34, %v867_v34  ;;  %v1795_v34 = vld [vmem:[%s2691_s20] ss:$0 sm:$0xff] }
 0x4b9   : > { %v2059_v36 = vpop.eup %2058 }
 0x4ba   : > { %1870 = vmatmul.mubr.msk.bf16.vlgmr.msra.gmra.mxu0 %vm807_vm3, %v868_v35  ;;  %v980_v27 = vmul.f32 %v2059_v36, %v2051_v18  ;;  %v1796_v36 = vld [vmem:[%s677_s0] ss:$0 sm:$0xff] }
 0x4bb   : > { %v1202_v37 = vpop.xlane.xlu0 %1201  ;;  %1881 = vmatprep.mubr.msk.bf16.mxu0 %vm2165_vm2, %v2164_v11 }
 0x4bc   : > { %v981_v40 = vpack.c.bf16 %v980_v27, %v980_v27 }
 0x4bf   : > { %v983_v38 = vpop.permute.xlu0 %982 }
 0x4c0   : > { %v988_v39 = vsel %vm874_vm4, %v983_v38, 0 }
 0x4c1   : > { %1880 = vmatpush3.bf16.msra.mxu0 %v988_v39  ;;  %v2038_v39 = vld [vmem:[%s2394_s9 + $0x38] sm:$0xff]  }
 0x4c2   : > { %1891 = vmatprep.subr.bf16.mxu0 %v2164_v11 }
 0x4c4   : > { %1882 = vmatmul.mubr.msk.bf16.vlgmr.msra.gmra.mxu0 %vm807_vm3, %v981_v40  ;;  %v2039_v40 = vld [vmem:[%s2394_s9 + $0x30] sm:$0xff]  }
 0x4c5   : > { %1893 = vmatprep.mubr.msk.bf16.mxu0 %vm2165_vm2, %v2164_v11 }
 0x4dc   : > { %v1090_v41 = vpop.xlane.xlu1 %1089 }
 0x4dd   : > { %2060 = vrcp.f32 %v1090_v41  ;;  %v2040_v41 = vld [vmem:[%s2394_s9 + $0x28] sm:$0xff]  }
 0x4de   : > { %2062 = vrcp.f32 %v1202_v37 }
 0x4e0   : > { %v1095_v42 = vpop.permute.xlu1 %1094 }
 0x4e1   : > { %v1100_v43 = vsel %vm874_vm4, %v1095_v42, 0  ;;  %v2041_v42 = vld [vmem:[%s2394_s9 + $0x20] sm:$0xff]  }
 0x4e2   : > { %1892 = vmatpush3.bf16.msra.mxu0 %v1100_v43  ;;  %v2042_v43 = vld [vmem:[%s2394_s9 + $0x18] sm:$0xff]  }
 0x4e3   : > { %1903 = vmatprep.subr.bf16.mxu0 %v2164_v11 }
 0x4e4   : > { %v1207_v46 = vpop.permute.xlu1 %1206 }
 0x4e5   : > { %v1212_v49 = vsel %vm874_vm4, %v1207_v46, 0  ;;  %v2045_v46 = vld [vmem:[%s2394_s9] sm:$0xff]  }
 0x4ea   : > { %v2061_v44 = vpop.eup %2060 }
 0x4eb   : > { %v1092_v45 = vmul.f32 %v2061_v44, %v2055_v26  ;;  %v2063_v48 = vpop.eup %2062  ;;  %v2043_v44 = vld [vmem:[%s2394_s9 + $0x10] sm:$0xff]  }
 0x4ec   : > { %v1204_v50 = vmul.f32 %v2063_v48, %v2053_v21 }
 0x4ed   : > { %v1093_v47 = vpack.c.bf16 %v1092_v45, %v1092_v45  ;;  %v2044_v45 = vld [vmem:[%s2394_s9 + $0x8] sm:$0xff]   ;;  %s2693_s9 = sld [smem:[#allocation6_spill]] }
 0x4ee   : > { %v1205_v51 = vpack.c.bf16 %v1204_v50, %v1204_v50 }
 0x4ef   : > { %1894 = vmatmul.mubr.msk.bf16.vlgmr.msra.gmra.mxu0 %vm807_vm3, %v1093_v47  ;;  %v1797_v47 = vld [vmem:[%s685_s13] ss:$0 sm:$0xff] }
 0x4f0   : > { %1904 = vmatpush3.bf16.msra.mxu0 %v1212_v49  ;;  %1905 = vmatprep.mubr.msk.bf16.mxu0 %vm2165_vm2, %v2164_v11 }
 0x4f1   : > { %1917 = vmatprep.subr.bf16.mxu0 %v2164_v11 }
 0x4f3   : > { %s2696_s16 = sand.u32 1, %s2693_s9  }
 0x4f7   : > { %1906 = vmatmul.mubr.msk.bf16.vlgmr.msra.gmra.mxu0 %vm807_vm3, %v1205_v51 }
 0x4f8   : > { %1921 = vmatprep.mubr.msk.bf16.mxu0 %vm2165_vm2, %v2164_v11  ;;  %1918 = vmatpush3.bf16.msra.mxu0 %v2036_v29 }
 0x4f9   : > { %1919 = vmatprep.subr.bf16.mxu0 %v2164_v11 }
 0x57a   : > { %v912_v52 = vpop.f32.mrf.mxu0 }
 0x57c   : > { %v1871_v53 = vpop.f32.mrf.mxu0 }
 0x57e   : > { %v915_v54 = vpop.f32.mrf.mxu0 }
 0x580   : > { %v1872_v55 = vpop.f32.mrf.mxu0 }
 0x584   : > { %v1024_v56 = vpop.f32.mrf.mxu0 }
 0x585   : > { %1255 = vrot.lane.b32.xlu0 %v1024_v56, %s2177_s27  ;;  %s1571_s27 = sshll.u32 %s2396_s2, 4  ;;  %s2570_s27 = int_to_ptr.vmem [resolvable:$true] %s1571_s27 }
 0x586   : > { %v1883_v57 = vpop.f32.mrf.mxu0  ;;  %s2070_s5 = scalar_lea.vmem %s2570_s27, 128  ;;  %p2077_p5 = scmp.lt.s32.totalorder %s2570_s27, %s2075_s21 }
 0x587   : > { %p2071_p1 = scmp.ne.s32.totalorder %s2570_s27, %s2070_s5  ;;  %p2078_p6 = scmp.lt.s32.totalorder %s2076_s7, %s2070_s5 }
 0x588   : > { %v1027_v58 = vpop.f32.mrf.mxu0 }
 0x589   : > { %p2072_p2 = pnand %p2071_p1, %p2310_p3  ;;  %p2079_p7 = por %p2078_p6, %p2077_p5 }
 0x58a   : > { %v1884_v59 = vpop.f32.mrf.mxu0 }
 0x58b   : > { %v1802_v59 = vld [vmem:[%s693_s15] ss:$0 sm:$0xff]  ;;  %s1558_s15 = scalar_lea.sflag [#allocation3], %s2696_s16  ;;  %p2073_p4 = pneg %p2072_p2 }
 0x58d   : > { %p2080_p8 = pnand %p2079_p7, %p2073_p4 }
 0x5af   : > { %v1136_v62 = vpop.f32.mrf.mxu0 }
 0x5b0   : > { %1259 = vrot.lane.b32.xlu1 %v1136_v62, %s2178_s30 }
 0x5b1   : > { %v1895_v63 = vpop.f32.mrf.mxu0 }
 0x5b3   : > { %v1139_v0 = vpop.f32.mrf.mxu0 }
 0x5b5   : > { %v1896_v1 = vpop.f32.mrf.mxu0 }
 0x5b7   : > { %v1248_v2 = vpop.f32.mrf.mxu0 }
 0x5b8   : > { %1263 = vrot.lane.b32.xlu0 %v1248_v2, %s2179_s25 }
 0x5b9   : > { %v1907_v4 = vpop.f32.mrf.mxu0 }
 0x5bb   : > { %v1251_v5 = vpop.f32.mrf.mxu0 }
 0x5bd   : > { %v1908_v6 = vpop.f32.mrf.mxu0 }
 0x5f7   : > { %v1256_v7 = vpop.permute.xlu0 %1255 }
 0x5f8   : > { %v1266_v9 = vsel %vm807_vm3, %v912_v52, %v1256_v7 }
 0x622   : > { %v1260_v8 = vpop.permute.xlu1 %1259 }
 0x623   : > { %v1268_v10 = vsel %vm1267_vm5, %v1266_v9, %v1260_v8 }
 0x62a   : > { %v1264_v12 = vpop.permute.xlu0 %1263 }
 0x62b   : > { %v1270_v13 = vsel %vm1269_vm6, %v1268_v10, %v1264_v12 }
 0x62c   : > { %v1271_v14 = vpack.c.bf16 %v1270_v13, %v1270_v13 }
 0x62e   : > { %1914 = vmatmul.mubr.msk.bf16.vlgmr.msra.gmra.mxu1 %vm707_vm1, %v1271_v14 }
 0x62f   : > { %1941 = vmatprep.mubr.msk.bf16.mxu1 %vm2165_vm2, %v2164_v11  ;;  %1926 = vmatpush3.bf16.msra.mxu1 %v2038_v39 }
 0x630   : > { %1927 = vmatprep.subr.bf16.mxu1 %v2164_v11 }
 0x633   : > { %1928 = vmatpush3.bf16.msra.mxu1 %v2039_v40 }
 0x634   : > { %1929 = vmatprep.subr.bf16.mxu1 %v2164_v11 }
 0x637   : > { %1930 = vmatpush3.bf16.msra.mxu1 %v2040_v41 }
 0x638   : > { %1931 = vmatprep.subr.bf16.mxu1 %v2164_v11 }
 0x63b   : > { %1932 = vmatpush3.bf16.msra.mxu1 %v2041_v42 }
 0x63c   : > { %1933 = vmatprep.subr.bf16.mxu1 %v2164_v11 }
 0x63f   : > { %1934 = vmatpush3.bf16.msra.mxu1 %v2042_v43 }
 0x640   : > { %1935 = vmatprep.subr.bf16.mxu1 %v2164_v11 }
 0x643   : > { %1936 = vmatpush3.bf16.msra.mxu1 %v2043_v44 }
 0x644   : > { %1937 = vmatprep.subr.bf16.mxu1 %v2164_v11 }
 0x647   : > { %1938 = vmatpush3.bf16.msra.mxu1 %v2044_v45 }
 0x648   : > { %1939 = vmatprep.subr.bf16.mxu1 %v2164_v11 }
 0x64b   : > { %1940 = vmatpush3.bf16.msra.mxu1 %v2045_v46 }
 0x6ee   : > { %v1332_v16 = vpop.f32.mrf.mxu1 }
 0x6ef   : > { %v1333_v17 = vadd.f32 %v1791_v15, %v1332_v16 }
 0x6f0   : > { %v1915_v18 = vpop.f32.mrf.mxu1 }
 0x6f1   : > { %v2517_v19 = vadd.f32 %v1333_v17, %v2404_v3  ;;  %v2037_v3 = vld [vmem:[%s2380_s18] sm:$0xff]  }
 0x6f2   : > { %v1335_v20 = vpop.f32.mrf.mxu1  ;;  %1920 = vmatpush3.bf16.msra.mxu0 %v2037_v3 }
 0x6f3   : > { %v1341_v21 = vsel %vm707_vm1, %v2517_v19, 0.0 }
 0x6f4   : > { %1342 = vadd.xlane.f32.xlu1 %v1341_v21  ;;  %v1916_v22 = vpop.f32.mrf.mxu1 }
 0x77d   : > { %v1343_v23 = vpop.xlane.xlu1 %1342 }
 0x77e   : > { %v1344_v24 = vmul.f32 0.03125, %v1343_v23 }
 0x780   : > { %v1345_v25 = vsub.f32 %v2517_v19, %v1344_v24 }
 0x782   : > { %v1346_v26 = vmul.f32 %v1345_v25, %v1345_v25 }
 0x784   : > { %v1347_v28 = vsel %vm707_vm1, %v1346_v26, 0.0 }
 0x785   : > { %1348 = vadd.xlane.f32.xlu0 %v1347_v28 }
 0x80e   : > { %v1349_v30 = vpop.xlane.xlu0 %1348 }
 0x80f   : > { %v1350_v31 = vmul.f32 0.03125, %v1349_v30 }
 0x811   : > { %v1351_v32 = vadd.f32 1e-05, %v1350_v31 }
 0x813   : > { %2064 = vrsqrt.f32 %v1351_v32 }
 0x820   : > { %v2065_v33 = vpop.eup %2064 }
 0x821   : > { %v1353_v35 = vmul.f32 %v2065_v33, %v1345_v25 }
 0x823   : > { %v1360_v37 = vmul.f32 %v1795_v34, %v1353_v35 }
 0x825   : > { %v1367_v27 = vadd.f32 %v1796_v36, %v1360_v37 }
 0x827   : > { %v1368_v38 = vpack.c.bf16 %v1367_v27, %v1367_v27 }
 0x829   : > { %1922 = vmatmul.mubr.msk.bf16.vlgmr.msra.gmra.mxu0 %vm707_vm1, %v1368_v38 }
 0x8e9   : > { %v1429_v48 = vpop.f32.mrf.mxu0 }
 0x8ea   : > { %v1430_v49 = vadd.f32 %v1797_v47, %v1429_v48 }
 0x8eb   : > { %v1923_v50 = vpop.f32.mrf.mxu0 }
 0x8ec   : > { %v1801_v51 = vmul.f32 -1.702, %v1430_v49 }
 0x8ed   : > { %v1432_v52 = vpop.f32.mrf.mxu0 }
 0x8ee   : > { %v1437_v53 = vmul.f32 1.442695, %v1801_v51 }
 0x8ef   : > { %v1924_v54 = vpop.f32.mrf.mxu0 }
 0x8f0   : > { %2066 = vpow2.f32 %v1437_v53 }
 0x8fd   : > { %v2067_v55 = vpop.eup %2066 }
 0x8fe   : > { %v1439_v11 = vadd.f32 1.0, %v2067_v55 }
 0x900   : > { %2068 = vrcp.f32 %v1439_v11 }
 0x90d   : > { %v2069_v56 = vpop.eup %2068 }
 0x90e   : > { %v1442_v57 = vmul.f32 %v2069_v56, %v1430_v49 }
 0x910   : > { %v1443_v58 = vpack.c.bf16 %v1442_v57, %v1442_v57 }
 0x912   : > { %1942 = vmatmul.mubr.bf16.vlgmr.msra.gmra.mxu1 %v1443_v58 }
 0x9d2   : > { %v1549_v60 = vpop.f32.mrf.mxu1 }
 0x9d3   : > { %v1550_v61 = vadd.f32 %v1802_v59, %v1549_v60 }
 0x9d4   : > { %v1943_v62 = vpop.f32.mrf.mxu1 }
 0x9d5   : > { %v1555_v63 = vadd.f32 %v1550_v61, %v2517_v19 }
 0x9d6   : > { %v1552_v0 = vpop.f32.mrf.mxu1 }
 0x9d7   : > { %1556 = vst.msk [vmem:[%s2396_s2] sm:$0xff] %vm707_vm1, %v1555_v63 }
 0x9d8   : > { %v1944_v1 = vpop.f32.mrf.mxu1 }
 0x9d9   : > { %2083 = shalt.err (!%p2080_p8)
}
 0x9da   : > { %s2084_s2 = scalar_lea.hbm %s2568_s22, 128  ;;  %s2088_s23 = scalar_lea.hbm %s2695_s26, 256 }
 0x9db   : > { %p2085_p10 = scmp.ne.s32.totalorder %s2568_s22, %s2084_s2  ;;  %p2089_p13 = scmp.lt.s32.totalorder %s2568_s22, %s2695_s26 }
 0x9dc   : > { %p2090_p0 = scmp.lt.s32.totalorder %s2088_s23, %s2084_s2 }
 0x9dd   : > { %p2086_p11 = pnand %p2085_p10, %p2310_p3 }
 0x9de   : > { %p2091_p1 = por %p2090_p0, %p2089_p13 }
 0x9df   : > { %p2087_p12 = pneg %p2086_p11 }
 0x9e1   : > { %p2092_p2 = pnand %p2091_p1, %p2087_p12 }
 0x9e3   : > { %2095 = shalt.err (!%p2092_p2)
}
 0x9e4   : > { %1945 = dma.vmem_to_hbm [thread:$0]  (%p2310_p3), %s2570_s27, 128, %s2568_s22, %s1558_s15  }
 0x9e5 PF: > { %s2697_s24 = sld [smem:[#allocation12_spill]] }
 0x9e6   : > { %s2698_s9 = sld [smem:[#allocation5_spill]] }
 0x9eb   : > { %p1951_p4 = scmp.ge.s32.totalorder %s2697_s24, 2 }
 0x9ec   : > { %s1583_s29 = sand.u32 1, %s2698_s9  }
 0x9ed   : > { %p1948_p5 = pnand %p1951_p4, %p2320_p9  ;;  %s1584_s28 = scalar_lea.sflag [#allocation3], %s1583_s29 }
 0x9ef   : > { %p1949_p6 = pneg %p1948_p5 }
 0x9f1   : > { %2129 = dma.done.wait (%p1949_p6), %s1584_s28, 128  }
 0x9f2   : > { %2131 = vsyncadd (%p1949_p6), %s1584_s28, 4294967168  ;;  %s28_s25 = sadd.s32 1, %s2697_s24   ;;  %s2700_s18 = sld [smem:[#allocation6_spill]] }
 0x9f3   : > { %p25_p7 = scmp.ge.s32.totalorder %s28_s25, 6   ;;  %s2701_s19 = sld [smem:[#allocation7_spill]] }
 0x9f4   : > { %s2702_s20 = sld [smem:[#allocation17_spill]] }
 0x9f5   : > { %s2703_s21 = sld [smem:[#allocation10_spill]]  ;;  %27 = sbr.rel (!%p25_p7) target bundleno = 14 (0xe), region = 155 }
 0x9f6   : > { %s2704_s22 = sld [smem:[#allocation11_spill]] }
 0x9f7   : > { %s2705_s23 = sld [smem:[#allocation13_spill]] }
 0x9f8   : > { %s2706_s24 = sld [smem:[#allocation15_spill]] }
 0x9fa   :  { %1589 = vsyncpa [#allocation3], 1 }
 0x9fb   :  { %1591 = vsyncpa [#allocation3 + $0x1], 1 }

</bundles_post_ra>
